<compile_context>
chip_gen: v5e
topology: v5e:2x2
jax: 0.10.0
libtpu: 0.0.40
codegen_flags: <defaults>
</compile_context>

<pallas_src>
import functools
import math

import jax
import jax.numpy as jnp
from jax.experimental import pallas as pl
from jax.experimental.pallas import tpu as pltpu


def _round_up(a, m):
    return (a + m - 1) // m * m


def _ln_kernel(x_ref, w_ref, b_ref, o_ref, *, eps):
    """Plain path: C is the full lane dim; XLU row reductions."""
    x = x_ref[...].astype(jnp.float32)                       # (tm, C)
    mu = jnp.mean(x, axis=-1, keepdims=True)
    xc = x - mu
    var = jnp.mean(xc * xc, axis=-1, keepdims=True)          # unbiased=False
    inv = jax.lax.rsqrt(var + eps)
    y = xc * inv * w_ref[...].astype(jnp.float32) + b_ref[...].astype(jnp.float32)
    o_ref[...] = y.astype(o_ref.dtype)


def _ln_packed_kernel(x_ref, w_ref, b_ref, seg_ref, o_ref, *, inv_c, eps):
    """Lane-dense path: g rows packed per lane-row (L = g*C, multiple of 128).

    Segmented per-row mean/var via a block-diagonal ones matrix on the MXU:
    (x @ seg) broadcasts each C-segment's sum back over its own lanes.  The
    matmul is row-local, so garbage rows in a ragged edge tile stay local and
    are masked on the store by Pallas.
    """
    x = x_ref[...].astype(jnp.float32)                       # (tm, L)
    seg = seg_ref[...]                                       # (L, L) f32 block-diag ones
    mu = jnp.dot(x, seg, preferred_element_type=jnp.float32) * inv_c
    xc = x - mu
    var = jnp.dot(xc * xc, seg, preferred_element_type=jnp.float32) * inv_c
    inv = jax.lax.rsqrt(var + eps)
    y = xc * inv * w_ref[...].astype(jnp.float32) + b_ref[...].astype(jnp.float32)
    o_ref[...] = y.astype(o_ref.dtype)


def withbias_layernorm(x, weight, bias, *, tile_rows=1024, eps=1e-5):
    """LayerNorm over the last dim with affine weight/bias (eps=1e-5).

    x: (..., C); weight, bias: (C,). Matches torch:
        (x - mean) / sqrt(var_biased + eps) * weight + bias
    """
    orig_shape = x.shape
    C = orig_shape[-1]
    rows = 1
    for d in orig_shape[:-1]:
        rows *= d
    x2 = x.reshape(rows, C)

    # ---- lane-dense packing: pack g rows per lane-row so L = g*C % 128 == 0 --
    g = 1
    if C < 128:
        cand = 128 // math.gcd(C, 128)          # smallest g with g*C % 128 == 0
        if cand > 1 and (rows % cand == 0) and (cand * C <= 512):
            g = cand
    L = g * C
    rows_p = rows // g
    x2 = x2.reshape(rows_p, L)                  # contiguous -> free

    w2 = jnp.tile(weight.reshape(-1), g).reshape(1, L)
    b2 = jnp.tile(bias.reshape(-1), g).reshape(1, L)

    # ---- row-tile size: big enough to amortize per-step overhead (~0.35 us),
    # small enough that double-buffered in+out + f32 temps fit every
    # generation's scoped VMEM (target ~2 MiB per input tile).
    bytes_per_row = L * 4
    cap_rows = max(8, ((2 * 1024 * 1024) // bytes_per_row) // 8 * 8)
    tm = max(8, min(tile_rows, cap_rows, _round_up(rows_p, 8)))
    grid = (pl.cdiv(rows_p, tm),)

    flops = 8 * rows * C
    if g > 1:
        flops += 4 * rows_p * L * L             # two (tm,L)x(L,L) MXU matmuls
    cost = pl.CostEstimate(
        flops=flops,
        transcendentals=rows,
        bytes_accessed=2 * rows * C * x.dtype.itemsize
        + 2 * C * weight.dtype.itemsize,
    )
    compiler_params = pltpu.CompilerParams(
        dimension_semantics=("parallel",),
        vmem_limit_bytes=32 * 1024 * 1024,
    )

    if g > 1:
        # Block-diagonal ones matrix: seg[i, j] = 1 iff i//C == j//C.
        idx = jnp.arange(L, dtype=jnp.int32) // C
        seg = (idx[:, None] == idx[None, :]).astype(jnp.float32)

        out = pl.pallas_call(
            functools.partial(_ln_packed_kernel, inv_c=1.0 / C, eps=eps),
            out_shape=jax.ShapeDtypeStruct((rows_p, L), x.dtype),
            grid_spec=pltpu.PrefetchScalarGridSpec(
                num_scalar_prefetch=0,
                grid=grid,
                in_specs=[
                    pl.BlockSpec((tm, L), lambda i: (i, 0)),
                    pl.BlockSpec((1, L), lambda i: (0, 0)),
                    pl.BlockSpec((1, L), lambda i: (0, 0)),
                    pl.BlockSpec((L, L), lambda i: (0, 0)),
                ],
                out_specs=pl.BlockSpec((tm, L), lambda i: (i, 0)),
            ),
            compiler_params=compiler_params,
            cost_estimate=cost,
        )(x2, w2, b2, seg)
    else:
        out = pl.pallas_call(
            functools.partial(_ln_kernel, eps=eps),
            out_shape=jax.ShapeDtypeStruct((rows_p, L), x.dtype),
            grid_spec=pltpu.PrefetchScalarGridSpec(
                num_scalar_prefetch=0,
                grid=grid,
                in_specs=[
                    pl.BlockSpec((tm, L), lambda i: (i, 0)),
                    pl.BlockSpec((1, L), lambda i: (0, 0)),
                    pl.BlockSpec((1, L), lambda i: (0, 0)),
                ],
                out_specs=pl.BlockSpec((tm, L), lambda i: (i, 0)),
            ),
            compiler_params=compiler_params,
            cost_estimate=cost,
        )(x2, w2, b2)

    return out.reshape(orig_shape)


def _reference_layernorm(x, weight, bias):
    mu = jnp.mean(x, axis=-1, keepdims=True)
    var = jnp.mean((x - mu) ** 2, axis=-1, keepdims=True)
    return (x - mu) / jnp.sqrt(var + 1e-5) * weight + bias


if __name__ == "__main__":
    key = jax.random.PRNGKey(0)
    k1, k2, k3, k4 = jax.random.split(key, 4)

    # Case 1: Restormer-style (b, h*w, c) with small channel dim (packed, L=128).
    batch, seq, hidden = 2, 64, 32
    x = jax.random.normal(k1, (batch, seq, hidden), dtype=jnp.float32)
    weight = jnp.ones((hidden,), dtype=jnp.float32)   # nn.Parameter(torch.ones)
    bias = jnp.zeros((hidden,), dtype=jnp.float32)    # nn.Parameter(torch.zeros)
    out = jax.block_until_ready(withbias_layernorm(x, weight, bias))
    ref = _reference_layernorm(x, weight, bias)
    assert out.shape == x.shape
    assert jnp.allclose(out, ref, atol=1e-4, rtol=1e-4)

    # Case 2: C = 48 (Restormer default dim) -> generalized packing, g=8, L=384.
    x2 = jax.random.normal(k2, (2, 64, 48), dtype=jnp.float32)
    w2 = jax.random.normal(k3, (48,), dtype=jnp.float32) * 0.1 + 1.0
    b2 = jnp.linspace(-0.5, 0.5, 48, dtype=jnp.float32)
    out2 = jax.block_until_ready(withbias_layernorm(x2, w2, b2))
    ref2 = _reference_layernorm(x2, w2, b2)
    assert out2.shape == x2.shape
    assert jnp.allclose(out2, ref2, atol=1e-4, rtol=1e-4)

    # Case 3: C >= 128 (plain path) with a ragged row count.
    x3 = jax.random.normal(k4, (3, 37, 128), dtype=jnp.float32)
    w3 = jnp.ones((128,), dtype=jnp.float32) * 1.1
    b3 = jnp.linspace(-0.5, 0.5, 128, dtype=jnp.float32)
    out3 = jax.block_until_ready(withbias_layernorm(x3, w3, b3))
    ref3 = _reference_layernorm(x3, w3, b3)
    assert out3.shape == x3.shape
    assert jnp.allclose(out3, ref3, atol=1e-4, rtol=1e-4)

    print("KERNEL_OK")
</pallas_src>

<mosaic_0001>
module attributes {stable_mosaic.version = 11 : i64} {
  func.func @_ln_packed_kernel(%arg0: i32, %arg1: memref<32x128xf32, #tpu.memory_space<vmem>>, %arg2: memref<1x128xf32, #tpu.memory_space<vmem>>, %arg3: memref<1x128xf32, #tpu.memory_space<vmem>>, %arg4: memref<128x128xf32, #tpu.memory_space<vmem>>, %arg5: memref<32x128xf32, #tpu.memory_space<vmem>>) attributes {dimension_semantics = [#tpu.dimension_semantics<parallel>], iteration_bounds = array<i64: 1>, scalar_prefetch = 0 : i64, scratch_operands = 0 : i64, tpu.core_type = #tpu.core_type<tc>, window_params = [{transform_indices = @transform_0, window_bounds = array<i64: 32, 128>}, {pipeline_mode = #tpu.pipeline_mode<synchronous>, transform_indices = @transform_1, window_bounds = array<i64: 1, 128>}, {pipeline_mode = #tpu.pipeline_mode<synchronous>, transform_indices = @transform_2, window_bounds = array<i64: 1, 128>}, {pipeline_mode = #tpu.pipeline_mode<synchronous>, transform_indices = @transform_3, window_bounds = array<i64: 128, 128>}, {transform_indices = @transform_4, window_bounds = array<i64: 32, 128>}]} {
    %c0 = arith.constant 0 : index
    %c0_0 = arith.constant 0 : index
    %0 = vector.load %arg1[%c0, %c0_0] : memref<32x128xf32, #tpu.memory_space<vmem>>, vector<32x128xf32>
    %c0_1 = arith.constant 0 : index
    %c0_2 = arith.constant 0 : index
    %1 = vector.load %arg4[%c0_1, %c0_2] : memref<128x128xf32, #tpu.memory_space<vmem>>, vector<128x128xf32>
    %cst = arith.constant dense<0.000000e+00> : vector<32x128xf32>
    %2 = tpu.matmul %0, %1, %cst {dimension_numbers = #tpu.dot_dimension_numbers<[1], [0], [0], [1], [0, 0, 1, 1], [], []>} : vector<32x128xf32>, vector<128x128xf32>, vector<32x128xf32> -> vector<32x128xf32>
    %cst_3 = arith.constant 3.125000e-02 : f32
    %3 = vector.broadcast %cst_3 : f32 to vector<32x128xf32>
    %4 = arith.mulf %2, %3 : vector<32x128xf32>
    %5 = arith.subf %0, %4 : vector<32x128xf32>
    %6 = arith.mulf %5, %5 : vector<32x128xf32>
    %cst_4 = arith.constant dense<0.000000e+00> : vector<32x128xf32>
    %7 = tpu.matmul %6, %1, %cst_4 {dimension_numbers = #tpu.dot_dimension_numbers<[1], [0], [0], [1], [0, 0, 1, 1], [], []>} : vector<32x128xf32>, vector<128x128xf32>, vector<32x128xf32> -> vector<32x128xf32>
    %cst_5 = arith.constant 3.125000e-02 : f32
    %8 = vector.broadcast %cst_5 : f32 to vector<32x128xf32>
    %9 = arith.mulf %7, %8 : vector<32x128xf32>
    %cst_6 = arith.constant 9.99999974E-6 : f32
    %10 = vector.broadcast %cst_6 : f32 to vector<32x128xf32>
    %11 = arith.addf %9, %10 : vector<32x128xf32>
    %12 = math.rsqrt %11 : vector<32x128xf32>
    %13 = arith.mulf %5, %12 : vector<32x128xf32>
    %c0_7 = arith.constant 0 : index
    %c0_8 = arith.constant 0 : index
    %14 = vector.load %arg2[%c0_7, %c0_8] : memref<1x128xf32, #tpu.memory_space<vmem>>, vector<1x128xf32>
    %15 = vector.broadcast %14 : vector<1x128xf32> to vector<32x128xf32>
    %16 = arith.mulf %13, %15 : vector<32x128xf32>
    %c0_9 = arith.constant 0 : index
    %c0_10 = arith.constant 0 : index
    %17 = vector.load %arg3[%c0_9, %c0_10] : memref<1x128xf32, #tpu.memory_space<vmem>>, vector<1x128xf32>
    %18 = vector.broadcast %17 : vector<1x128xf32> to vector<32x128xf32>
    %19 = arith.addf %16, %18 : vector<32x128xf32>
    %c0_11 = arith.constant 0 : index
    %c0_12 = arith.constant 0 : index
    %20 = vector.load %arg5[%c0_11, %c0_12] : memref<32x128xf32, #tpu.memory_space<vmem>>, vector<32x128xf32>
    tpu.vector_store %arg5[%c0_11, %c0_12], %19 {strides = array<i32>} : memref<32x128xf32, #tpu.memory_space<vmem>>, vector<32x128xf32>,
    return
  }
  func.func @transform_0(%arg0: i32) -> (i32, i32) {
    %c0_i32 = arith.constant 0 : i32
    %c0_i32_0 = arith.constant 0 : i32
    return %arg0, %c0_i32 : i32, i32
  }
  func.func @transform_1(%arg0: i32) -> (i32, i32) {
    %c0_i32 = arith.constant 0 : i32
    %c0_i32_0 = arith.constant 0 : i32
    %c0_i32_1 = arith.constant 0 : i32
    return %c0_i32, %c0_i32_0 : i32, i32
  }
  func.func @transform_2(%arg0: i32) -> (i32, i32) {
    %c0_i32 = arith.constant 0 : i32
    %c0_i32_0 = arith.constant 0 : i32
    %c0_i32_1 = arith.constant 0 : i32
    return %c0_i32, %c0_i32_0 : i32, i32
  }
  func.func @transform_3(%arg0: i32) -> (i32, i32) {
    %c0_i32 = arith.constant 0 : i32
    %c0_i32_0 = arith.constant 0 : i32
    %c0_i32_1 = arith.constant 0 : i32
    return %c0_i32, %c0_i32_0 : i32, i32
  }
  func.func @transform_4(%arg0: i32) -> (i32, i32) {
    %c0_i32 = arith.constant 0 : i32
    %c0_i32_0 = arith.constant 0 : i32
    return %arg0, %c0_i32 : i32, i32
  }
}

</mosaic_0001>

<bundles_post_ra>
// kernel: tpu_custom_call.1
= control target key start
LH: loop header
LB: loop body
LE: loop exit
PB: predicated region body
PF: predicated region fallthrough
CT: control target
= control target key end

     0   :  { %9 = vsyncpa [#allocation3], 0  ;;  %s460_s0 = inlined_call_operand.hbm [shape: f32[32,128], index: 0, kind: input, shape index: {}]   ;;  %s461_s1 = inlined_call_operand.hbm [shape: f32[1,128], index: 1, kind: input, shape index: {}]   ;;  %s462_s2 = inlined_call_operand.vmem [shape: f32[1,128], index: 2, kind: input, shape index: {}]   ;;  %s463_s3 = inlined_call_operand.hbm [shape: f32[128,128], index: 3, kind: input, shape index: {}]   ;;  %s464_s4 = inlined_call_operand.hbm [shape: f32[32,128], index: 4, kind: output, shape index: {}]  }
   0x1   :  { %10 = vsyncpa [#allocation6], 0  ;;  %s30_s17 = sshll.u32 %s461_s1, 4  ;;  %s31_s17 = int_to_ptr.hbm [resolvable:$true] %s30_s17 }
   0x2   :  { %11 = vsyncpa [#allocation4], 0  ;;  %s395_s18 = smov [#allocation5]   ;;  %s16_s22 = sshll.u32 %s460_s0, 4  ;;  %s17_s22 = int_to_ptr.hbm [resolvable:$true] %s16_s22 }
   0x3   :  { %s32_s19 = sshll.u32 %s395_s18, 4  ;;  %s396_s23 = smov [#allocation2]   ;;  %s33_s19 = int_to_ptr.vmem [resolvable:$true] %s32_s19 }
   0x4   :  { %35 = dma.hbm_to_vmem [thread:$0]  %s31_s17, 16, %s33_s19, [#allocation6]  }
   0x5   :  { %s18_s24 = sshll.u32 %s396_s23, 4  ;;  %s397_s25 = smov 128   ;;  %s19_s24 = int_to_ptr.vmem [resolvable:$true] %s18_s24 }
   0x6   :  { %s398_s26 = smov 8   ;;  %s42_s28 = sshll.u32 %s463_s3, 4  ;;  %s43_s28 = int_to_ptr.hbm [resolvable:$true] %s42_s28 }
   0x7   :  { %24 = dma.hbm_to_vmem [thread:$0]  %s17_s22, 512, %s19_s24, [#allocation3], %s397_s25, %s397_s25, %s398_s26  }
   0x8   :  { %s399_s29 = smov [#allocation7]  }
   0x9   :  { %s44_s30 = sshll.u32 %s399_s29, 4  ;;  %s45_s30 = int_to_ptr.vmem [resolvable:$true] %s44_s30 }
   0xa   :  { %50 = dma.hbm_to_vmem [thread:$0]  %s43_s28, 2048, %s45_s30, [#allocation6], %s397_s25, %s397_s25, %s398_s26  }
   0xb   :  { %389 = dma.done.wait [#allocation3], 512  }
   0xc   :  { %390 = vsyncadd [#allocation3], 4294966784 }
   0xd   :  { %391 = dma.done.wait [#allocation6], 2064  }
   0xe   :  { %392 = vsyncadd [#allocation6], 4294965232  ;;  %v82_v0 = vld [vmem:[#allocation7 + $0x78] sm:$0xff]  ;;  %v81_v1 = vld [vmem:[#allocation7 + $0x70] sm:$0xff]  ;;  %s231_s8 = sshll.u32 %s464_s4, 4  ;;  %s232_s8 = int_to_ptr.hbm [resolvable:$true] %s231_s8 }
   0xf   :  { %83 = vmatpush.msra.mxu0 %v82_v0  ;;  %245 = vmatpush.msra.mxu2 %v82_v0  ;;  %v80_v2 = vld [vmem:[#allocation7 + $0x68] sm:$0xff]  ;;  %v79_v3 = vld [vmem:[#allocation7 + $0x60] sm:$0xff]  ;;  %v78_v4 = vld [vmem:[#allocation7 + $0x58] sm:$0xff] }
  0x10   :  { %124 = vmatpush.msra.mxu1 %v82_v0  ;;  %261 = vmatpush.msra.mxu3 %v82_v0  ;;  %v77_v5 = vld [vmem:[#allocation7 + $0x50] sm:$0xff]  ;;  %v76_v6 = vld [vmem:[#allocation7 + $0x48] sm:$0xff]  ;;  %v75_v7 = vld [vmem:[#allocation7 + $0x40] sm:$0xff] }
  0x11   :  { %84 = vmatpush.msra.mxu0 %v81_v1  ;;  %246 = vmatpush.msra.mxu2 %v81_v1  ;;  %v74_v8 = vld [vmem:[#allocation7 + $0x38] sm:$0xff]  ;;  %v73_v9 = vld [vmem:[#allocation7 + $0x30] sm:$0xff]  ;;  %v72_v10 = vld [vmem:[#allocation7 + $0x28] sm:$0xff] }
  0x12   :  { %125 = vmatpush.msra.mxu1 %v81_v1  ;;  %262 = vmatpush.msra.mxu3 %v81_v1  ;;  %v71_v11 = vld [vmem:[#allocation7 + $0x20] sm:$0xff]  ;;  %v70_v12 = vld [vmem:[#allocation7 + $0x18] sm:$0xff]  ;;  %v69_v13 = vld [vmem:[#allocation7 + $0x10] sm:$0xff] }
  0x13   :  { %85 = vmatpush.msra.mxu0 %v80_v2  ;;  %247 = vmatpush.msra.mxu2 %v80_v2  ;;  %v68_v14 = vld [vmem:[#allocation7 + $0x8] sm:$0xff]  ;;  %v67_v15 = vld [vmem:[#allocation7] sm:$0xff]  ;;  %v66_v19 = vld [vmem:[#allocation2 + $0x18] sm:$0xff] }
  0x14   :  { %126 = vmatpush.msra.mxu1 %v80_v2  ;;  %263 = vmatpush.msra.mxu3 %v80_v2  ;;  %v63_v16 = vld [vmem:[#allocation2] sm:$0xff]  ;;  %v65_v17 = vld [vmem:[#allocation2 + $0x10] sm:$0xff]  ;;  %v64_v18 = vld [vmem:[#allocation2 + $0x8] sm:$0xff] }
  0x15   :  { %86 = vmatpush.msra.mxu0 %v79_v3  ;;  %248 = vmatpush.msra.mxu2 %v79_v3  ;;  %v283_v54 = vld [vmem:[#allocation5] ss:$0 sm:$0xff] }
  0x16   :  { %127 = vmatpush.msra.mxu1 %v79_v3  ;;  %264 = vmatpush.msra.mxu3 %v79_v3  ;;  %v284_v60 = vld [vmem:[%s462_s2] ss:$0 sm:$0xff]  ;;  %s400_s2 = smov [#allocation8]  }
  0x17   :  { %87 = vmatpush.msra.mxu0 %v78_v4  ;;  %249 = vmatpush.msra.mxu2 %v78_v4  ;;  %s229_s5 = sshll.u32 %s400_s2, 4  ;;  %s230_s5 = int_to_ptr.vmem [resolvable:$true] %s229_s5 }
  0x18   :  { %128 = vmatpush.msra.mxu1 %v78_v4  ;;  %265 = vmatpush.msra.mxu3 %v78_v4 }
  0x19   :  { %88 = vmatpush.msra.mxu0 %v77_v5  ;;  %250 = vmatpush.msra.mxu2 %v77_v5 }
  0x1a   :  { %129 = vmatpush.msra.mxu1 %v77_v5  ;;  %266 = vmatpush.msra.mxu3 %v77_v5 }
  0x1b   :  { %89 = vmatpush.msra.mxu0 %v76_v6  ;;  %251 = vmatpush.msra.mxu2 %v76_v6 }
  0x1c   :  { %130 = vmatpush.msra.mxu1 %v76_v6  ;;  %267 = vmatpush.msra.mxu3 %v76_v6 }
  0x1d   :  { %90 = vmatpush.msra.mxu0 %v75_v7  ;;  %252 = vmatpush.msra.mxu2 %v75_v7 }
  0x1e   :  { %131 = vmatpush.msra.mxu1 %v75_v7  ;;  %268 = vmatpush.msra.mxu3 %v75_v7 }
  0x1f   :  { %91 = vmatpush.msra.mxu0 %v74_v8  ;;  %253 = vmatpush.msra.mxu2 %v74_v8 }
  0x20   :  { %132 = vmatpush.msra.mxu1 %v74_v8  ;;  %269 = vmatpush.msra.mxu3 %v74_v8 }
  0x21   :  { %92 = vmatpush.msra.mxu0 %v73_v9  ;;  %254 = vmatpush.msra.mxu2 %v73_v9 }
  0x22   :  { %133 = vmatpush.msra.mxu1 %v73_v9  ;;  %270 = vmatpush.msra.mxu3 %v73_v9 }
  0x23   :  { %93 = vmatpush.msra.mxu0 %v72_v10  ;;  %255 = vmatpush.msra.mxu2 %v72_v10 }
  0x24   :  { %134 = vmatpush.msra.mxu1 %v72_v10  ;;  %271 = vmatpush.msra.mxu3 %v72_v10 }
  0x25   :  { %94 = vmatpush.msra.mxu0 %v71_v11  ;;  %256 = vmatpush.msra.mxu2 %v71_v11 }
  0x26   :  { %135 = vmatpush.msra.mxu1 %v71_v11  ;;  %272 = vmatpush.msra.mxu3 %v71_v11 }
  0x27   :  { %95 = vmatpush.msra.mxu0 %v70_v12  ;;  %257 = vmatpush.msra.mxu2 %v70_v12 }
  0x28   :  { %136 = vmatpush.msra.mxu1 %v70_v12  ;;  %273 = vmatpush.msra.mxu3 %v70_v12 }
  0x29   :  { %96 = vmatpush.msra.mxu0 %v69_v13  ;;  %258 = vmatpush.msra.mxu2 %v69_v13 }
  0x2a   :  { %137 = vmatpush.msra.mxu1 %v69_v13  ;;  %274 = vmatpush.msra.mxu3 %v69_v13 }
  0x2b   :  { %97 = vmatpush.msra.mxu0 %v68_v14  ;;  %259 = vmatpush.msra.mxu2 %v68_v14 }
  0x2c   :  { %138 = vmatpush.msra.mxu1 %v68_v14  ;;  %275 = vmatpush.msra.mxu3 %v68_v14 }
  0x2d   :  { %98 = vmatpush.msra.mxu0 %v67_v15  ;;  %260 = vmatpush.msra.mxu2 %v67_v15 }
  0x2e   :  { %99 = vmatmul.f32.vlgmr.msra.gmra.mxu0 %v63_v16  ;;  %105 = vmatmul.f32.vlgmr.msra.gmra.mxu2 %v65_v17 }
  0x2f   :  { %139 = vmatpush.msra.mxu1 %v67_v15  ;;  %276 = vmatpush.msra.mxu3 %v67_v15 }
  0x36   :  { %102 = vmatmul.f32.gmra.mxu0 %v64_v18  ;;  %108 = vmatmul.f32.gmra.mxu2 %v66_v19 }
  0xab   :  { %v100_v20 = vpop.f32.mrf.mxu0 }
  0xac   :  { %v112_v21 = vmul.f32 0.03125, %v100_v20 }
  0xae   :  { %v116_v22 = vsub.f32 %v63_v16, %v112_v21 }
  0xb0   :  { %v120_v23 = vmul.f32 %v116_v22, %v116_v22 }
  0xb1   :  { %v106_v24 = vpop.f32.mrf.mxu2 }
  0xb2   :  { %v114_v25 = vmul.f32 0.03125, %v106_v24  ;;  %140 = vmatmul.f32.vlgmr.msra.gmra.mxu1 %v120_v23 }
  0xb3   :  { %v103_v26 = vpop.f32.mrf.mxu0 }
  0xb4   :  { %v441_v27 = vsub.f32 %v65_v17, %v114_v25  ;;  %v113_v28 = vmul.f32 0.03125, %v103_v26 }
  0xb6   :  { %v117_v29 = vsub.f32 %v64_v18, %v113_v28  ;;  %v122_v30 = vmul.f32 %v441_v27, %v441_v27 }
  0xb8   :  { %146 = vmatmul.f32.vlgmr.msra.gmra.mxu3 %v122_v30  ;;  %v121_v31 = vmul.f32 %v117_v29, %v117_v29 }
  0xb9   :  { %v109_v32 = vpop.f32.mrf.mxu2 }
  0xba   :  { %v115_v33 = vmul.f32 0.03125, %v109_v32  ;;  %143 = vmatmul.f32.gmra.mxu1 %v121_v31 }
  0xbc   :  { %v445_v34 = vsub.f32 %v66_v19, %v115_v33 }
  0xbe   :  { %v123_v35 = vmul.f32 %v445_v34, %v445_v34 }
  0xc0   :  { %149 = vmatmul.f32.gmra.mxu3 %v123_v35 }
 0x12f   :  { %v141_v36 = vpop.f32.mrf.mxu1 }
 0x130   :  { %v153_v37 = vmul.f32 0.03125, %v141_v36 }
 0x132   :  { %v157_v38 = vadd.f32 1e-05, %v153_v37 }
 0x134   :  { %285 = vrsqrt.f32 %v157_v38  ;;  %vm167_vm0 = vweird.f32 %v157_v38 }
 0x137   :  { %v144_v39 = vpop.f32.mrf.mxu1 }
 0x138   :  { %v154_v40 = vmul.f32 0.03125, %v144_v39 }
 0x13a   :  { %v286_v41 = vpop.eup %285  ;;  %v158_v42 = vadd.f32 1e-05, %v154_v40 }
 0x13b   :  { %v162_v43 = vmul.f32 %v286_v41, %v157_v38  ;;  %v147_v44 = vpop.f32.mrf.mxu3  ;;  %vm168_vm1 = vweird.f32 %v286_v41 }
 0x13c   :  { %287 = vrsqrt.f32 %v158_v42  ;;  %v155_v45 = vmul.f32 0.03125, %v147_v44  ;;  %vm169_vm2 = vmor %vm167_vm0, %vm168_vm1  ;;  %vm177_vm3 = vweird.f32 %v158_v42 }
 0x13d   :  { %v163_v46 = vmul.f32 %v286_v41, %v162_v43 }
 0x13e   :  { %v159_v47 = vadd.f32 1e-05, %v155_v45 }
 0x13f   :  { %v164_v48 = vmul.f32 0.5, %v163_v46 }
 0x140   :  { %289 = vrsqrt.f32 %v159_v47  ;;  %vm187_vm7 = vweird.f32 %v159_v47 }
 0x141   :  { %v165_v49 = vsub.f32 1.5, %v164_v48 }
 0x142   :  { %v288_v50 = vpop.eup %287 }
 0x143   :  { %v166_v51 = vmul.f32 %v286_v41, %v165_v49  ;;  %v172_v52 = vmul.f32 %v288_v50, %v158_v42  ;;  %v150_v53 = vpop.f32.mrf.mxu3  ;;  %vm178_vm4 = vweird.f32 %v288_v50 }
 0x144   :  { %v156_v55 = vmul.f32 0.03125, %v150_v53  ;;  %vm179_vm5 = vmor %vm177_vm3, %vm178_vm4 }
 0x145   :  { %v170_v56 = vsel %vm169_vm2, %v286_v41, %v166_v51  ;;  %v173_v57 = vmul.f32 %v288_v50, %v172_v52 }
 0x146   :  { %v290_v58 = vpop.eup %289  ;;  %v201_v59 = vmul.f32 %v170_v56, %v116_v22  ;;  %v160_v61 = vadd.f32 1e-05, %v156_v55 }
 0x147   :  { %v174_v62 = vmul.f32 0.5, %v173_v57  ;;  %v182_v63 = vmul.f32 %v290_v58, %v159_v47  ;;  %vm188_vm6 = vweird.f32 %v290_v58 }
 0x148   :  { %v209_v0 = vmul.f32 %v283_v54, %v201_v59  ;;  %291 = vrsqrt.f32 %v160_v61  ;;  %vm189_vm8 = vmor %vm187_vm7, %vm188_vm6  ;;  %vm197_vm10 = vweird.f32 %v160_v61 }
 0x149   :  { %v175_v1 = vsub.f32 1.5, %v174_v62  ;;  %v183_v2 = vmul.f32 %v290_v58, %v182_v63 }
 0x14a   :  { %v217_v3 = vadd.f32 %v284_v60, %v209_v0 }
 0x14b   :  { %v176_v4 = vmul.f32 %v288_v50, %v175_v1  ;;  %v184_v5 = vmul.f32 0.5, %v183_v2 }
 0x14c   :  { %221 = vst [vmem:[#allocation8] sm:$0xff] %v217_v3 }
 0x14d   :  { %v180_v6 = vsel %vm179_vm5, %v288_v50, %v176_v4  ;;  %v185_v7 = vsub.f32 1.5, %v184_v5 }
 0x14e   :  { %v292_v8 = vpop.eup %291  ;;  %v202_v9 = vmul.f32 %v180_v6, %v117_v29 }
 0x14f   :  { %v186_v10 = vmul.f32 %v290_v58, %v185_v7  ;;  %v192_v11 = vmul.f32 %v292_v8, %v160_v61  ;;  %vm198_vm9 = vweird.f32 %v292_v8 }
 0x150   :  { %v210_v12 = vmul.f32 %v283_v54, %v202_v9  ;;  %vm199_vm11 = vmor %vm197_vm10, %vm198_vm9 }
 0x151   :  { %v190_v13 = vsel %vm189_vm8, %v290_v58, %v186_v10  ;;  %v193_v14 = vmul.f32 %v292_v8, %v192_v11 }
 0x152   :  { %v218_v15 = vadd.f32 %v284_v60, %v210_v12  ;;  %v203_v16 = vmul.f32 %v190_v13, %v441_v27 }
 0x153   :  { %v194_v17 = vmul.f32 0.5, %v193_v14 }
 0x154   :  { %222 = vst [vmem:[#allocation8 + $0x8] sm:$0xff] %v218_v15  ;;  %v211_v18 = vmul.f32 %v283_v54, %v203_v16 }
 0x155   :  { %v195_v19 = vsub.f32 1.5, %v194_v17 }
 0x156   :  { %v219_v20 = vadd.f32 %v284_v60, %v211_v18 }
 0x157   :  { %v196_v21 = vmul.f32 %v292_v8, %v195_v19 }
 0x158   :  { %223 = vst [vmem:[#allocation8 + $0x10] sm:$0xff] %v219_v20 }
 0x159   :  { %v200_v22 = vsel %vm199_vm11, %v292_v8, %v196_v21 }
 0x15a   :  { %v204_v23 = vmul.f32 %v200_v22, %v445_v34 }
 0x15c   :  { %v212_v24 = vmul.f32 %v283_v54, %v204_v23 }
 0x15e   :  { %v220_v25 = vadd.f32 %v284_v60, %v212_v24 }
 0x160   :  { %224 = vst [vmem:[#allocation8 + $0x18] sm:$0xff] %v220_v25 }
 0x161   :  { %237 = dma.vmem_to_hbm [thread:$0]  %s230_s5, 512, %s232_s8, [#allocation4], %s397_s25, %s397_s25, %s398_s26  }
 0x162   :  { %393 = dma.done.wait [#allocation4], 512  }
 0x163   :  { %394 = vsyncadd [#allocation4], 4294966784 }
 0x164   :  { %242 = vsyncpa [#allocation3], 1 }
 0x165   :  { %243 = vsyncpa [#allocation6], 1 }
 0x166   :  { %244 = vsyncpa [#allocation4], 1 }

</bundles_post_ra>
